<compile_context>
chip_gen: v7x
topology: tpu7x:2x2x1
jax: 0.10.0
libtpu: 0.0.40
codegen_flags: <defaults>
</compile_context>

<pallas_src>
import jax
import jax.numpy as jnp
from jax import lax
from jax.experimental import pallas as pl
from jax.experimental.pallas import tpu as pltpu


def _round_up(v, m):
    return (v + m - 1) // m * m


def _padded_bytes(shape2d, dtype):
    """VMEM footprint of a 2-D block after (8, 128) sublane/lane padding."""
    r = _round_up(shape2d[0], 8)
    c = _round_up(shape2d[1], 128)
    return r * c * jnp.dtype(dtype).itemsize


def _make_mlp_kernel(n_hidden, compute_dtype):
    """Kernel over one (batch_tile, in_dim) input block; activations are feature-major."""

    def kernel(*refs):
        x_ref = refs[0]           # (tile, in_dim)  compute_dtype   (native layout)
        o_ref = refs[-1]          # (1, tile)       f32             (lane-dense row)
        prm = refs[1:-1]          # w1, b1, ..., wN, bN, w_out_col, b_out(SMEM)

        # Layer 1: contract on features -> feature-major (out_f, tile); batch stays on lanes.
        h = lax.dot_general(
            prm[0][...], x_ref[...],
            dimension_numbers=(((1,), (1,)), ((), ())),
            preferred_element_type=jnp.float32)
        h = jnp.maximum(h + prm[1][...], 0.0)          # bias + ReLU in f32 (dropout = identity)

        # Remaining hidden layers: (out_f, in_f) @ (in_f, tile) on the MXU, f32 accumulation.
        for l in range(1, n_hidden):
            w = prm[2 * l][...]
            h = jnp.dot(w, h.astype(compute_dtype), preferred_element_type=jnp.float32)
            h = jnp.maximum(h + prm[2 * l + 1][...], 0.0)

        # Output head Linear(h_last, 1): VPU broadcast-multiply + sublane (XLU) reduction
        # -> lane-dense (1, tile) row; no N=1 MXU matmul and no masked store.
        row = jnp.sum(h * prm[-2][...], axis=0, keepdims=True)      # (1, tile) f32
        o_ref[...] = (row + prm[-1][0]).astype(o_ref.dtype)         # scalar bias from SMEM

    return kernel


def mlp_regression_forward(x, params, *, batch_tile=2048, compute_dtype=jnp.float32):
    """Fused MLP forward. Returns flattened (B,) predictions like the PyTorch module."""
    assert len(params) >= 4 and len(params) % 2 == 0
    n_hidden = len(params) // 2 - 1
    B, in_dim = x.shape
    assert params[0].shape[1] == in_dim

    # ---- batch tiling: large lane-dense tiles; keep >= 2 grid steps when B > 128 so both
    #      v7x TensorCores get work (harmless on single-TC v5e/v6e) --------------------------
    if B <= 128:
        tile = 128
    else:
        tile = min(max(128, _round_up(batch_tile, 128)),
                   max(128, _round_up(pl.cdiv(B, 2), 128)))
    n_tiles = pl.cdiv(B, tile)
    B_pad = n_tiles * tile

    # Native (B, in_dim) layout: no wrapper transpose / pad HBM pass.  For the bf16 path the
    # input should ideally already be stored as bf16 upstream (halves the kernel's HBM reads);
    # here we only cast if needed.
    if x.dtype != compute_dtype:
        x = x.astype(compute_dtype)

    def build_and_run(single_buffer_weights):
        def const_spec(shape):
            # Grid-invariant operand: index_map is constant, one VMEM buffer is enough.
            if single_buffer_weights:
                return pl.BlockSpec(shape, lambda i: (0, 0), pipeline_mode=pl.Buffered(1))
            return pl.BlockSpec(shape, lambda i: (0, 0))

        nbuf = 1 if single_buffer_weights else 2
        inputs = [x]
        in_specs = [pl.BlockSpec((tile, in_dim), lambda i: (i, 0))]
        vmem_est = 2 * _padded_bytes((tile, in_dim), compute_dtype)    # double-buffered x tiles

        for l in range(n_hidden):
            w, b = params[2 * l], params[2 * l + 1]                    # PyTorch layout (out, in), (out,)
            out_f, in_f = w.shape
            inputs.append(w.astype(compute_dtype))
            in_specs.append(const_spec((out_f, in_f)))
            inputs.append(b.astype(jnp.float32).reshape(out_f, 1))
            in_specs.append(const_spec((out_f, 1)))
            vmem_est += nbuf * (_padded_bytes((out_f, in_f), compute_dtype)
                                + _padded_bytes((out_f, 1), jnp.float32))
            vmem_est += _padded_bytes((out_f, tile), jnp.float32)      # live activation slab

        w_out, b_out = params[-2], params[-1]                          # (1, h_last), (1,)
        h_last = w_out.size
        inputs.append(w_out.astype(jnp.float32).reshape(h_last, 1))
        in_specs.append(const_spec((h_last, 1)))
        inputs.append(b_out.astype(jnp.float32).reshape(-1))           # scalar bias -> SMEM
        in_specs.append(pl.BlockSpec(memory_space=pltpu.MemorySpace.SMEM))
        vmem_est += nbuf * _padded_bytes((h_last, 1), jnp.float32)
        vmem_est += 2 * _padded_bytes((1, tile), jnp.float32)          # double-buffered output rows

        # Guard rail only: footprint is a few MiB even at tile=2048; 32 MiB is within the scoped
        # default everywhere and leaves plenty of headroom on v7x's 64 MiB physical VMEM.
        vmem_limit = int(min(max(2 * vmem_est, 8 * 1024 * 1024), 32 * 1024 * 1024))

        return pl.pallas_call(
            _make_mlp_kernel(n_hidden, compute_dtype),
            out_shape=jax.ShapeDtypeStruct((1, B_pad), jnp.float32),
            grid_spec=pltpu.PrefetchScalarGridSpec(
                num_scalar_prefetch=0,
                grid=(n_tiles,),
                in_specs=in_specs,
                out_specs=pl.BlockSpec((1, tile), lambda i: (0, i)),   # lane-dense output block
            ),
            compiler_params=pltpu.CompilerParams(
                dimension_semantics=("parallel",),
                vmem_limit_bytes=vmem_limit,
            ),
        )(*inputs)

    try:
        out = build_and_run(single_buffer_weights=True)
    except Exception:
        # pl.Buffered(1) pipeline hint not supported by this jax build -> plain specs.
        out = build_and_run(single_buffer_weights=False)

    return out.reshape(-1)[:B]   # == x.flatten() of the PyTorch module output


def init_params(key, input_dim, hidden_dims):
    """Deterministic synthetic parameters, PyTorch nn.Linear shapes: W (out,in), b (out,)."""
    dims = [input_dim] + list(hidden_dims) + [1]
    params = []
    for i in range(len(dims) - 1):
        key, kw, kb = jax.random.split(key, 3)
        fan_in, fan_out = dims[i], dims[i + 1]
        bound = 1.0 / (fan_in ** 0.5)
        w = jax.random.uniform(kw, (fan_out, fan_in), jnp.float32, -bound, bound)
        b = jax.random.uniform(kb, (fan_out,), jnp.float32, -bound, bound)
        params.extend([w, b])
    return tuple(params)


def reference_forward(x, params):
    """Plain-JAX reference for the same forward pass (dropout = identity)."""
    n_layers = len(params) // 2
    h = x
    for l in range(n_layers - 1):
        w, b = params[2 * l], params[2 * l + 1]
        h = jnp.maximum(h @ w.T + b, 0.0)
    w, b = params[-2], params[-1]
    return (h @ w.T + b).reshape(-1)


if __name__ == "__main__":
    # Small shapes consistent with the module: batch=16, input_dim=16, hidden_dims=[32, 64]
    input_dim = 16
    hidden_dims = [32, 64]
    batch = 16

    key = jax.random.PRNGKey(0)
    kx, kp, kx2, kx3, kp3 = jax.random.split(key, 5)

    x = jax.random.normal(kx, (batch, input_dim), dtype=jnp.float32)
    params = init_params(kp, input_dim, hidden_dims)

    # 1) Small batch: single 128-lane tile, grid=(1,), f32.
    y = jax.block_until_ready(mlp_regression_forward(x, params))
    y_ref = reference_forward(x, params)
    assert y.shape == (batch,)
    assert jnp.allclose(y, y_ref, atol=1e-4, rtol=1e-4), "kernel mismatch vs reference (small batch)"

    # 2) Larger batch: grid clamps to >= 2 lane-dense tiles (256 each) -> both v7x TCs get work.
    B2 = 512
    x2 = jax.random.normal(kx2, (B2, input_dim), dtype=jnp.float32)
    y2 = jax.block_until_ready(mlp_regression_forward(x2, params))
    y2_ref = reference_forward(x2, params)
    assert y2.shape == (B2,)
    assert jnp.allclose(y2, y2_ref, atol=1e-4, rtol=1e-4), "kernel mismatch vs reference (tiled batch)"

    # 3) Ragged batch: exercises the partial trailing input block (no wrapper pad pass).
    B3 = 300
    x3 = jax.random.normal(kx3, (B3, input_dim), dtype=jnp.float32)
    y3 = jax.block_until_ready(mlp_regression_forward(x3, params))
    assert y3.shape == (B3,)
    assert jnp.allclose(y3, reference_forward(x3, params), atol=1e-4, rtol=1e-4), \
        "kernel mismatch vs reference (ragged batch)"

    # 4) bf16 compute path (v6e/v7x MXU fast path), f32 accumulation — loose tolerance.
    y2_bf16 = jax.block_until_ready(
        mlp_regression_forward(x2, params, compute_dtype=jnp.bfloat16))
    assert jnp.allclose(y2_bf16, y2_ref, atol=1e-1, rtol=1e-1), "bf16 path diverged from f32 reference"

    # 5) Arbitrary hidden-layer count.
    params3 = init_params(kp3, input_dim, [32, 64, 32])
    y5 = jax.block_until_ready(mlp_regression_forward(x, params3))
    assert jnp.allclose(y5, reference_forward(x, params3), atol=1e-4, rtol=1e-4), \
        "kernel mismatch vs reference (3 hidden layers)"

    print("KERNEL_OK")
</pallas_src>

<mosaic_0001>
module attributes {stable_mosaic.version = 11 : i64} {
  func.func @kernel(%arg0: i32, %arg1: memref<128x16xf32, #tpu.memory_space<vmem>>, %arg2: memref<32x16xf32, #tpu.memory_space<vmem>>, %arg3: memref<32x1xf32, #tpu.memory_space<vmem>>, %arg4: memref<64x32xf32, #tpu.memory_space<vmem>>, %arg5: memref<64x1xf32, #tpu.memory_space<vmem>>, %arg6: memref<64x1xf32, #tpu.memory_space<vmem>>, %arg7: memref<1xf32, #tpu.memory_space<smem>>, %arg8: memref<1x128xf32, #tpu.memory_space<vmem>>) attributes {dimension_semantics = [#tpu.dimension_semantics<parallel>], iteration_bounds = array<i64: 1>, scalar_prefetch = 0 : i64, scratch_operands = 0 : i64, tpu.core_type = #tpu.core_type<tc>, window_params = [{transform_indices = @transform_0, window_bounds = array<i64: 128, 16>}, {pipeline_mode = #tpu.pipeline_mode<synchronous>, transform_indices = @transform_1, window_bounds = array<i64: 32, 16>}, {pipeline_mode = #tpu.pipeline_mode<synchronous>, transform_indices = @transform_2, window_bounds = array<i64: 32, 1>}, {pipeline_mode = #tpu.pipeline_mode<synchronous>, transform_indices = @transform_3, window_bounds = array<i64: 64, 32>}, {pipeline_mode = #tpu.pipeline_mode<synchronous>, transform_indices = @transform_4, window_bounds = array<i64: 64, 1>}, {pipeline_mode = #tpu.pipeline_mode<synchronous>, transform_indices = @transform_5, window_bounds = array<i64: 64, 1>}, {transform_indices = @transform_6, window_bounds = array<i64: 1>}, {transform_indices = @transform_7, window_bounds = array<i64: 1, 128>}]} {
    %c0 = arith.constant 0 : index
    %c0_0 = arith.constant 0 : index
    %0 = vector.load %arg2[%c0, %c0_0] : memref<32x16xf32, #tpu.memory_space<vmem>>, vector<32x16xf32>
    %c0_1 = arith.constant 0 : index
    %c0_2 = arith.constant 0 : index
    %1 = vector.load %arg1[%c0_1, %c0_2] : memref<128x16xf32, #tpu.memory_space<vmem>>, vector<128x16xf32>
    %cst = arith.constant dense<0.000000e+00> : vector<32x128xf32>
    %2 = tpu.matmul %0, %1, %cst {dimension_numbers = #tpu.dot_dimension_numbers<[1], [1], [0], [0], [0, 0, 1, 0], [], []>} : vector<32x16xf32>, vector<128x16xf32>, vector<32x128xf32> -> vector<32x128xf32>
    %c0_3 = arith.constant 0 : index
    %c0_4 = arith.constant 0 : index
    %3 = vector.load %arg3[%c0_3, %c0_4] : memref<32x1xf32, #tpu.memory_space<vmem>>, vector<32x1xf32>
    %4 = vector.broadcast %3 : vector<32x1xf32> to vector<32x128xf32>
    %5 = arith.addf %2, %4 : vector<32x128xf32>
    %cst_5 = arith.constant 0.000000e+00 : f32
    %6 = vector.broadcast %cst_5 : f32 to vector<32x128xf32>
    %7 = arith.maximumf %5, %6 : vector<32x128xf32>
    %c0_6 = arith.constant 0 : index
    %c0_7 = arith.constant 0 : index
    %8 = vector.load %arg4[%c0_6, %c0_7] : memref<64x32xf32, #tpu.memory_space<vmem>>, vector<64x32xf32>
    %cst_8 = arith.constant dense<0.000000e+00> : vector<64x128xf32>
    %9 = tpu.matmul %8, %7, %cst_8 {dimension_numbers = #tpu.dot_dimension_numbers<[1], [0], [0], [1], [0, 0, 1, 1], [], []>} : vector<64x32xf32>, vector<32x128xf32>, vector<64x128xf32> -> vector<64x128xf32>
    %c0_9 = arith.constant 0 : index
    %c0_10 = arith.constant 0 : index
    %10 = vector.load %arg5[%c0_9, %c0_10] : memref<64x1xf32, #tpu.memory_space<vmem>>, vector<64x1xf32>
    %11 = vector.broadcast %10 : vector<64x1xf32> to vector<64x128xf32>
    %12 = arith.addf %9, %11 : vector<64x128xf32>
    %cst_11 = arith.constant 0.000000e+00 : f32
    %13 = vector.broadcast %cst_11 : f32 to vector<64x128xf32>
    %14 = arith.maximumf %12, %13 : vector<64x128xf32>
    %c0_12 = arith.constant 0 : index
    %c0_13 = arith.constant 0 : index
    %15 = vector.load %arg6[%c0_12, %c0_13] : memref<64x1xf32, #tpu.memory_space<vmem>>, vector<64x1xf32>
    %16 = vector.broadcast %15 : vector<64x1xf32> to vector<64x128xf32>
    %17 = arith.mulf %14, %16 : vector<64x128xf32>
    %cst_14 = arith.constant dense<0.000000e+00> : vector<128xf32>
    %18 = vector.multi_reduction <add>, %17, %cst_14 [0] : vector<64x128xf32> to vector<128xf32>
    %19 = vector.shape_cast %18 : vector<128xf32> to vector<1x128xf32>
    %c0_15 = arith.constant 0 : index
    %20 = memref.load %arg7[%c0_15] : memref<1xf32, #tpu.memory_space<smem>>
    %21 = vector.broadcast %20 : f32 to vector<1x128xf32>
    %22 = arith.addf %19, %21 : vector<1x128xf32>
    %c0_16 = arith.constant 0 : index
    %c0_17 = arith.constant 0 : index
    %23 = vector.load %arg8[%c0_16, %c0_17] : memref<1x128xf32, #tpu.memory_space<vmem>>, vector<1x128xf32>
    tpu.vector_store %arg8[%c0_16, %c0_17], %22 {strides = array<i32>} : memref<1x128xf32, #tpu.memory_space<vmem>>, vector<1x128xf32>,
    return
  }
  func.func @transform_0(%arg0: i32) -> (i32, i32) {
    %c0_i32 = arith.constant 0 : i32
    %c0_i32_0 = arith.constant 0 : i32
    return %arg0, %c0_i32 : i32, i32
  }
  func.func @transform_1(%arg0: i32) -> (i32, i32) {
    %c0_i32 = arith.constant 0 : i32
    %c0_i32_0 = arith.constant 0 : i32
    %c0_i32_1 = arith.constant 0 : i32
    return %c0_i32, %c0_i32_0 : i32, i32
  }
  func.func @transform_2(%arg0: i32) -> (i32, i32) {
    %c0_i32 = arith.constant 0 : i32
    %c0_i32_0 = arith.constant 0 : i32
    %c0_i32_1 = arith.constant 0 : i32
    return %c0_i32, %c0_i32_0 : i32, i32
  }
  func.func @transform_3(%arg0: i32) -> (i32, i32) {
    %c0_i32 = arith.constant 0 : i32
    %c0_i32_0 = arith.constant 0 : i32
    %c0_i32_1 = arith.constant 0 : i32
    return %c0_i32, %c0_i32_0 : i32, i32
  }
  func.func @transform_4(%arg0: i32) -> (i32, i32) {
    %c0_i32 = arith.constant 0 : i32
    %c0_i32_0 = arith.constant 0 : i32
    %c0_i32_1 = arith.constant 0 : i32
    return %c0_i32, %c0_i32_0 : i32, i32
  }
  func.func @transform_5(%arg0: i32) -> (i32, i32) {
    %c0_i32 = arith.constant 0 : i32
    %c0_i32_0 = arith.constant 0 : i32
    %c0_i32_1 = arith.constant 0 : i32
    return %c0_i32, %c0_i32_0 : i32, i32
  }
  func.func @transform_6(%arg0: i32) -> i32 {
    %c0_i32 = arith.constant 0 : i32
    %c0_i32_0 = arith.constant 0 : i32
    return %c0_i32 : i32
  }
  func.func @transform_7(%arg0: i32) -> (i32, i32) {
    %c0_i32 = arith.constant 0 : i32
    %c0_i32_0 = arith.constant 0 : i32
    return %c0_i32, %arg0 : i32, i32
  }
}

module attributes {stable_mosaic.version = 11 : i64} {
  func.func @kernel(%arg0: i32, %arg1: memref<128x16xf32, #tpu.memory_space<vmem>>, %arg2: memref<32x16xf32, #tpu.memory_space<vmem>>, %arg3: memref<32x1xf32, #tpu.memory_space<vmem>>, %arg4: memref<64x32xf32, #tpu.memory_space<vmem>>, %arg5: memref<64x1xf32, #tpu.memory_space<vmem>>, %arg6: memref<64x1xf32, #tpu.memory_space<vmem>>, %arg7: memref<1xf32, #tpu.memory_space<smem>>, %arg8: memref<1x128xf32, #tpu.memory_space<vmem>>) attributes {dimension_semantics = [#tpu.dimension_semantics<parallel>], iteration_bounds = array<i64: 1>, scalar_prefetch = 0 : i64, scratch_operands = 0 : i64, tpu.core_type = #tpu.core_type<tc>, window_params = [{transform_indices = @transform_0, window_bounds = array<i64: 128, 16>}, {pipeline_mode = #tpu.pipeline_mode<synchronous>, transform_indices = @transform_1, window_bounds = array<i64: 32, 16>}, {pipeline_mode = #tpu.pipeline_mode<synchronous>, transform_indices = @transform_2, window_bounds = array<i64: 32, 1>}, {pipeline_mode = #tpu.pipeline_mode<synchronous>, transform_indices = @transform_3, window_bounds = array<i64: 64, 32>}, {pipeline_mode = #tpu.pipeline_mode<synchronous>, transform_indices = @transform_4, window_bounds = array<i64: 64, 1>}, {pipeline_mode = #tpu.pipeline_mode<synchronous>, transform_indices = @transform_5, window_bounds = array<i64: 64, 1>}, {transform_indices = @transform_6, window_bounds = array<i64: 1>}, {transform_indices = @transform_7, window_bounds = array<i64: 1, 128>}]} {
    %c0 = arith.constant 0 : index
    %c0_0 = arith.constant 0 : index
    %0 = vector.load %arg2[%c0, %c0_0] : memref<32x16xf32, #tpu.memory_space<vmem>>, vector<32x16xf32>
    %c0_1 = arith.constant 0 : index
    %c0_2 = arith.constant 0 : index
    %1 = vector.load %arg1[%c0_1, %c0_2] : memref<128x16xf32, #tpu.memory_space<vmem>>, vector<128x16xf32>
    %cst = arith.constant dense<0.000000e+00> : vector<32x128xf32>
    %2 = tpu.matmul %0, %1, %cst {dimension_numbers = #tpu.dot_dimension_numbers<[1], [1], [0], [0], [0, 0, 1, 0], [], []>} : vector<32x16xf32>, vector<128x16xf32>, vector<32x128xf32> -> vector<32x128xf32>
    %c0_3 = arith.constant 0 : index
    %c0_4 = arith.constant 0 : index
    %3 = vector.load %arg3[%c0_3, %c0_4] : memref<32x1xf32, #tpu.memory_space<vmem>>, vector<32x1xf32>
    %4 = vector.broadcast %3 : vector<32x1xf32> to vector<32x128xf32>
    %5 = arith.addf %2, %4 : vector<32x128xf32>
    %cst_5 = arith.constant 0.000000e+00 : f32
    %6 = vector.broadcast %cst_5 : f32 to vector<32x128xf32>
    %7 = arith.maximumf %5, %6 : vector<32x128xf32>
    %c0_6 = arith.constant 0 : index
    %c0_7 = arith.constant 0 : index
    %8 = vector.load %arg4[%c0_6, %c0_7] : memref<64x32xf32, #tpu.memory_space<vmem>>, vector<64x32xf32>
    %cst_8 = arith.constant dense<0.000000e+00> : vector<64x128xf32>
    %9 = tpu.matmul %8, %7, %cst_8 {dimension_numbers = #tpu.dot_dimension_numbers<[1], [0], [0], [1], [0, 0, 1, 1], [], []>} : vector<64x32xf32>, vector<32x128xf32>, vector<64x128xf32> -> vector<64x128xf32>
    %c0_9 = arith.constant 0 : index
    %c0_10 = arith.constant 0 : index
    %10 = vector.load %arg5[%c0_9, %c0_10] : memref<64x1xf32, #tpu.memory_space<vmem>>, vector<64x1xf32>
    %11 = vector.broadcast %10 : vector<64x1xf32> to vector<64x128xf32>
    %12 = arith.addf %9, %11 : vector<64x128xf32>
    %cst_11 = arith.constant 0.000000e+00 : f32
    %13 = vector.broadcast %cst_11 : f32 to vector<64x128xf32>
    %14 = arith.maximumf %12, %13 : vector<64x128xf32>
    %c0_12 = arith.constant 0 : index
    %c0_13 = arith.constant 0 : index
    %15 = vector.load %arg6[%c0_12, %c0_13] : memref<64x1xf32, #tpu.memory_space<vmem>>, vector<64x1xf32>
    %16 = vector.broadcast %15 : vector<64x1xf32> to vector<64x128xf32>
    %17 = arith.mulf %14, %16 : vector<64x128xf32>
    %cst_14 = arith.constant dense<0.000000e+00> : vector<128xf32>
    %18 = vector.multi_reduction <add>, %17, %cst_14 [0] : vector<64x128xf32> to vector<128xf32>
    %19 = vector.shape_cast %18 : vector<128xf32> to vector<1x128xf32>
    %c0_15 = arith.constant 0 : index
    %20 = memref.load %arg7[%c0_15] : memref<1xf32, #tpu.memory_space<smem>>
    %21 = vector.broadcast %20 : f32 to vector<1x128xf32>
    %22 = arith.addf %19, %21 : vector<1x128xf32>
    %c0_16 = arith.constant 0 : index
    %c0_17 = arith.constant 0 : index
    %23 = vector.load %arg8[%c0_16, %c0_17] : memref<1x128xf32, #tpu.memory_space<vmem>>, vector<1x128xf32>
    tpu.vector_store %arg8[%c0_16, %c0_17], %22 {strides = array<i32>} : memref<1x128xf32, #tpu.memory_space<vmem>>, vector<1x128xf32>,
    return
  }
  func.func @transform_0(%arg0: i32) -> (i32, i32) {
    %c0_i32 = arith.constant 0 : i32
    %c0_i32_0 = arith.constant 0 : i32
    return %arg0, %c0_i32 : i32, i32
  }
  func.func @transform_1(%arg0: i32) -> (i32, i32) {
    %c0_i32 = arith.constant 0 : i32
    %c0_i32_0 = arith.constant 0 : i32
    %c0_i32_1 = arith.constant 0 : i32
    return %c0_i32, %c0_i32_0 : i32, i32
  }
  func.func @transform_2(%arg0: i32) -> (i32, i32) {
    %c0_i32 = arith.constant 0 : i32
    %c0_i32_0 = arith.constant 0 : i32
    %c0_i32_1 = arith.constant 0 : i32
    return %c0_i32, %c0_i32_0 : i32, i32
  }
  func.func @transform_3(%arg0: i32) -> (i32, i32) {
    %c0_i32 = arith.constant 0 : i32
    %c0_i32_0 = arith.constant 0 : i32
    %c0_i32_1 = arith.constant 0 : i32
    return %c0_i32, %c0_i32_0 : i32, i32
  }
  func.func @transform_4(%arg0: i32) -> (i32, i32) {
    %c0_i32 = arith.constant 0 : i32
    %c0_i32_0 = arith.constant 0 : i32
    %c0_i32_1 = arith.constant 0 : i32
    return %c0_i32, %c0_i32_0 : i32, i32
  }
  func.func @transform_5(%arg0: i32) -> (i32, i32) {
    %c0_i32 = arith.constant 0 : i32
    %c0_i32_0 = arith.constant 0 : i32
    %c0_i32_1 = arith.constant 0 : i32
    return %c0_i32, %c0_i32_0 : i32, i32
  }
  func.func @transform_6(%arg0: i32) -> i32 {
    %c0_i32 = arith.constant 0 : i32
    %c0_i32_0 = arith.constant 0 : i32
    return %c0_i32 : i32
  }
  func.func @transform_7(%arg0: i32) -> (i32, i32) {
    %c0_i32 = arith.constant 0 : i32
    %c0_i32_0 = arith.constant 0 : i32
    return %c0_i32, %arg0 : i32, i32
  }
}

</mosaic_0001>

<bundles_post_ra>
// kernel: tpu_custom_call.1
= control target key start
LH: loop header
LB: loop body
LE: loop exit
PB: predicated region body
PF: predicated region fallthrough
CT: control target
= control target key end

     0   :  { %vm72_vm0 = vcmask 130048   ;;  %v705_v6 = vmov 0   ;;  %s956_s0 = inlined_call_operand.vmem [shape: f32[16,16], index: 0, kind: input, shape index: {}]   ;;  %s957_s1 = inlined_call_operand.vmem [shape: f32[32,16], index: 1, kind: input, shape index: {}]   ;;  %s958_s2 = inlined_call_operand.vmem [shape: f32[32,1], index: 2, kind: input, shape index: {}]   ;;  %s959_s3 = inlined_call_operand.vmem [shape: f32[64,32], index: 3, kind: input, shape index: {}]   ;;  %s960_s4 = inlined_call_operand.vmem [shape: f32[64,1], index: 4, kind: input, shape index: {}]   ;;  %s961_s5 = inlined_call_operand.vmem [shape: f32[64,1], index: 5, kind: input, shape index: {}]   ;;  %s962_s6 = inlined_call_operand.<no memory space> [shape: f32[1], index: 6, kind: input, shape index: {}]   ;;  %s963_s7 = inlined_call_operand.hbm [shape: f32[1,128], index: 7, kind: output, shape index: {}]  }
   0x1   :  { %v32_v0 = vld [vmem:[%s956_s0] sm:$0xff]  ;;  %v33_v1 = vld [vmem:[%s956_s0 + $0x8] sm:$0xff]  ;;  %v34_v2 = vld [vmem:[%s956_s0 + $0x10] sm:$0xff]  ;;  %679 = vset.pattern.permute.xlu0 %v705_v6  ;;  %680 = vset.pattern.permute.xlu1 %v705_v6 }
   0x2   :  { %v621_v3 = vpack.c.bf16 %v33_v1, %v32_v0  ;;  %vm758_vm1 = vmpackc.low %vm72_vm0, %vm72_vm0  ;;  %v35_v5 = vld [vmem:[%s956_s0 + $0x18] sm:$0xff]  ;;  %v28_v8 = vld [vmem:[%s957_s1] sm:$0xff] }
   0x3   :  { %v627_v7 = vpack.c.bf16 %v35_v5, %v34_v2  ;;  %v36_v9 = vld [vmem:[%s956_s0 + $0x20] sm:$0xff]  ;;  %v37_v10 = vld [vmem:[%s956_s0 + $0x28] sm:$0xff]  ;;  %595 = vmatprep.mubr.msk.f32.mxu0 %vm72_vm0, %v28_v8  ;;  %v50_v12 = vld [vmem:[%s958_s2 + $0x10] sm:$0xff] }
   0x4   :  { %623 = vmatprep.subr.msk.bf16.mxu0 %vm758_vm1, %v621_v3  ;;  %v48_v11 = vld [vmem:[%s958_s2] sm:$0xff]  ;;  %64 = vperm.xlu1 %680, %v50_v12   ;;  %v633_v13 = vpack.c.bf16 %v37_v10, %v36_v9  ;;  %v49_v14 = vld [vmem:[%s958_s2 + $0x8] sm:$0xff]  ;;  %v51_v15 = vld [vmem:[%s958_s2 + $0x18] sm:$0xff] }
   0x5   :  { %626 = vmatpush3.bf16.xpose.msk.msra.mxu0 %vm758_vm1, %v621_v3  ;;  %54 = vperm.xlu0 %679, %v48_v11   ;;  %v230_v16 = vld [vmem:[%s960_s4] sm:$0xff] }
   0x6   :  { %629 = vmatprep.subr.msk.bf16.mxu0 %vm758_vm1, %v627_v7 }
   0x8   :  { %69 = vperm.xlu1 %680, %v51_v15  }
   0x9   :  { %59 = vperm.xlu0 %679, %v49_v14  }
   0xd   :  { %632 = vmatpush3.bf16.xpose.msk.msra.mxu0 %vm758_vm1, %v627_v7 }
   0xe   :  { %635 = vmatprep.subr.msk.bf16.mxu0 %vm758_vm1, %v633_v13 }
   0xf   :  { %13 = vsyncpa [#allocation4], 0  ;;  %v38_v17 = vld [vmem:[%s956_s0 + $0x30] sm:$0xff]  ;;  %v39_v18 = vld [vmem:[%s956_s0 + $0x38] sm:$0xff]  ;;  %240 = vperm.xlu0 %679, %v230_v16   ;;  %vm278_vm2 = vcmask 261120   ;;  %s706_s21 = smov [#allocation3]  }
  0x10   :  { %v231_v19 = vld [vmem:[%s960_s4 + $0x8] sm:$0xff]  ;;  %v639_v20 = vpack.c.bf16 %v39_v18, %v38_v17  ;;  %v232_v21 = vld [vmem:[%s960_s4 + $0x10] sm:$0xff]  ;;  %v233_v22 = vld [vmem:[%s960_s4 + $0x18] sm:$0xff]  ;;  %s495_s22 = sshll.u32 %s706_s21, 4  ;;  %s496_s22 = int_to_ptr.vmem [resolvable:$true] %s495_s22 }
  0x11   :  { %245 = vperm.xlu1 %680, %v231_v19   ;;  %v416_v23 = vld [vmem:[%s961_s5] sm:$0xff]  ;;  %v41_v25 = vld [vmem:[%s956_s0 + $0x48] sm:$0xff]  ;;  %v418_v29 = vld [vmem:[%s961_s5 + $0x10] sm:$0xff]  ;;  %s681_s23 = scalar_lea.vmem %s496_s22, 16  ;;  %s685_s24 = scalar_lea.vmem %s496_s22, 32 }
  0x12   :  { %v40_v24 = vld [vmem:[%s956_s0 + $0x40] sm:$0xff]  ;;  %v417_v26 = vld [vmem:[%s961_s5 + $0x8] sm:$0xff]  ;;  %v42_v31 = vld [vmem:[%s956_s0 + $0x50] sm:$0xff]  ;;  %p682_p0 = scmp.ne.s32.totalorder %s496_s22, %s681_s23  ;;  %p686_p1 = scmp.lt.s32.totalorder %s496_s22, %s496_s22 }
  0x13   :  { %250 = vperm.xlu0 %679, %v232_v21   ;;  %v645_v27 = vpack.c.bf16 %v41_v25, %v40_v24  ;;  %v234_v28 = vld [vmem:[%s960_s4 + $0x20] sm:$0xff]  ;;  %v235_v30 = vld [vmem:[%s960_s4 + $0x28] sm:$0xff]  ;;  %v43_v32 = vld [vmem:[%s956_s0 + $0x58] sm:$0xff]  ;;  %p687_p2 = scmp.lt.s32.totalorder %s685_s24, %s681_s23 }
  0x14   :  { %v419_v33 = vld [vmem:[%s961_s5 + $0x18] sm:$0xff]  ;;  %v651_v34 = vpack.c.bf16 %v43_v32, %v42_v31  ;;  %v236_v35 = vld [vmem:[%s960_s4 + $0x30] sm:$0xff]  ;;  %v420_v36 = vld [vmem:[%s961_s5 + $0x20] sm:$0xff] }
  0x15   :  { %638 = vmatpush3.bf16.xpose.msk.msra.mxu0 %vm758_vm1, %v633_v13  ;;  %255 = vperm.xlu1 %680, %v233_v22   ;;  %v237_v37 = vld [vmem:[%s960_s4 + $0x38] sm:$0xff]  ;;  %v44_v38 = vld [vmem:[%s956_s0 + $0x60] sm:$0xff]  ;;  %v45_v39 = vld [vmem:[%s956_s0 + $0x68] sm:$0xff]  ;;  %p688_p3 = por %p687_p2, %p686_p1 }
  0x16   :  { %641 = vmatprep.subr.msk.bf16.mxu0 %vm758_vm1, %v639_v20  ;;  %v421_v40 = vld [vmem:[%s961_s5 + $0x28] sm:$0xff]  ;;  %v657_v41 = vpack.c.bf16 %v45_v39, %v44_v38  ;;  %v422_v42 = vld [vmem:[%s961_s5 + $0x30] sm:$0xff]  ;;  %v423_v43 = vld [vmem:[%s961_s5 + $0x38] sm:$0xff] }
  0x17   :  { %426 = vperm.xlu0 %679, %v416_v23   ;;  %v46_v44 = vld [vmem:[%s956_s0 + $0x70] sm:$0xff]  ;;  %v47_v45 = vld [vmem:[%s956_s0 + $0x78] sm:$0xff]  ;;  %v29_v47 = vld [vmem:[%s957_s1 + $0x8] sm:$0xff]  ;;  %p689_p4 = pnand %p688_p3, %p682_p0 }
  0x18   :  { %v663_v46 = vpack.c.bf16 %v47_v45, %v46_v44  ;;  %v30_v48 = vld [vmem:[%s957_s1 + $0x10] sm:$0xff]  ;;  %v31_v49 = vld [vmem:[%s957_s1 + $0x18] sm:$0xff]  ;;  %v222_v50 = vld [vmem:[%s959_s3] sm:$0xff] }
  0x19   :  { %431 = vperm.xlu1 %680, %v417_v26   ;;  %609 = vmatprep.mubr.msk.f32.mxu1 %vm278_vm2, %v222_v50  ;;  %v223_v5 = vld [vmem:[%s959_s3 + $0x8] sm:$0xff]  ;;  %v224_v6 = vld [vmem:[%s959_s3 + $0x10] sm:$0xff]  ;;  %v225_v7 = vld [vmem:[%s959_s3 + $0x18] sm:$0xff] }
  0x1a   :  { %v226_v8 = vld [vmem:[%s959_s3 + $0x20] sm:$0xff]  ;;  %v227_v9 = vld [vmem:[%s959_s3 + $0x28] sm:$0xff]  ;;  %v228_v10 = vld [vmem:[%s959_s3 + $0x30] sm:$0xff] }
  0x1b   :  { %260 = vperm.xlu0 %679, %v234_v28   ;;  %v229_v11 = vld [vmem:[%s959_s3 + $0x38] sm:$0xff] }
  0x1d   :  { %644 = vmatpush3.bf16.xpose.msk.msra.mxu0 %vm758_vm1, %v639_v20  ;;  %436 = vperm.xlu1 %680, %v418_v29  }
  0x1e   :  { %647 = vmatprep.subr.msk.bf16.mxu0 %vm758_vm1, %v645_v27 }
  0x1f   :  { %265 = vperm.xlu0 %679, %v235_v30  }
  0x21   :  { %441 = vperm.xlu1 %680, %v419_v33  }
  0x23   :  { %270 = vperm.xlu0 %679, %v236_v35  }
  0x25   :  { %650 = vmatpush3.bf16.xpose.msk.msra.mxu0 %vm758_vm1, %v645_v27  ;;  %446 = vperm.xlu1 %680, %v420_v36  }
  0x26   :  { %653 = vmatprep.subr.msk.bf16.mxu0 %vm758_vm1, %v651_v34 }
  0x27   :  { %275 = vperm.xlu0 %679, %v237_v37  }
  0x29   :  { %451 = vperm.xlu1 %680, %v421_v40  }
  0x2b   :  { %456 = vperm.xlu0 %679, %v422_v42  }
  0x2d   :  { %656 = vmatpush3.bf16.xpose.msk.msra.mxu0 %vm758_vm1, %v651_v34  ;;  %461 = vperm.xlu1 %680, %v423_v43  }
  0x2e   :  { %659 = vmatprep.subr.msk.bf16.mxu0 %vm758_vm1, %v657_v41 }
  0x35   :  { %662 = vmatpush3.bf16.xpose.msk.msra.mxu0 %vm758_vm1, %v657_v41 }
  0x36   :  { %665 = vmatprep.subr.msk.bf16.mxu0 %vm758_vm1, %v663_v46 }
  0x3d   :  { %668 = vmatpush3.bf16.xpose.msk.msra.mxu0 %vm758_vm1, %v663_v46 }
  0x44   :  { %596 = vmatmul.mubr.msk.f32.vlgmr.msra.gmra.mrb[0].mxu0 %vm72_vm0, %v29_v47 }
  0x45   :  { %598 = vmatprep.mubr.msk.f32.mxu0 %vm72_vm0, %v30_v48 }
  0x48   :  { %599 = vmatmul.mubr.msk.f32.gmra.mrb[2].mxu0 %vm72_vm0, %v31_v49 }
  0x83   :  { %v65_v52 = vpop.permute.xlu1 %64 }
  0x84   :  { %v55_v51 = vpop.permute.xlu0 %54 }
  0x87   :  { %v70_v59 = vpop.permute.xlu1 %69 }
  0x88   :  { %v60_v53 = vpop.permute.xlu0 %59 }
  0x8e   :  { %v241_v12 = vpop.permute.xlu0 %240 }
  0x90   :  { %v246_v13 = vpop.permute.xlu1 %245 }
  0x92   :  { %v251_v14 = vpop.permute.xlu0 %250 }
  0x94   :  { %v256_v15 = vpop.permute.xlu1 %255 }
  0x96   :  { %v427_v16 = vpop.permute.xlu0 %426 }
  0x98   :  { %v432_v17 = vpop.permute.xlu1 %431 }
  0x9a   :  { %v261_v18 = vpop.permute.xlu0 %260 }
  0x9c   :  { %v437_v19 = vpop.permute.xlu1 %436 }
  0x9e   :  { %v266_v20 = vpop.permute.xlu0 %265 }
  0xa0   :  { %v442_v22 = vpop.permute.xlu1 %441 }
  0xa2   :  { %v271_v29 = vpop.permute.xlu0 %270 }
  0xa4   :  { %v447_v35 = vpop.permute.xlu1 %446 }
  0xa6   :  { %v276_v44 = vpop.permute.xlu0 %275 }
  0xa8   :  { %v452_v50 = vpop.permute.xlu1 %451 }
 0x117   :  { %v597_v54 = vpop.f32.mrb[0].mxu0 }
 0x118   :  { %v205_v55 = vadd.f32 %v597_v54, %v60_v53  ;;  %v199_v56 = vpop.f32.mrb[1].mxu0 }
 0x119   :  { %v200_v57 = vadd.f32 %v199_v56, %v55_v51 }
 0x11a   :  { %v219_v58 = vmax.f32 %v205_v55, 0.0 }
 0x11b   :  { %v218_v60 = vmax.f32 %v200_v57, 0.0  ;;  %v600_v61 = vpop.f32.mrb[2].mxu0 }
 0x11c   :  { %v215_v62 = vadd.f32 %v600_v61, %v70_v59  ;;  %v209_v63 = vpop.f32.mrb[3].mxu0 }
 0x11d   :  { %v210_v0 = vadd.f32 %v209_v63, %v65_v52  ;;  %v669_v1 = vpack.c.bf16 %v219_v58, %v218_v60  ;;  %v457_v60 = vpop.permute.xlu0 %456  ;;  %v462_v63 = vpop.permute.xlu1 %461 }
 0x11e   :  { %v221_v2 = vmax.f32 %v215_v62, 0.0 }
 0x11f   :  { %v220_v3 = vmax.f32 %v210_v0, 0.0  ;;  %670 = vmatprep.subr.bf16.mxu1 %v669_v1 }
 0x120   :  { %672 = vmatpush3.bf16.msra.mxu1 %v669_v1 }
 0x121   :  { %v673_v4 = vpack.c.bf16 %v221_v2, %v220_v3 }
 0x123   :  { %674 = vmatprep.subr.bf16.mxu1 %v673_v4 }
 0x124   :  { %676 = vmatpush3.bf16.msra.mxu1 %v673_v4 }
 0x127   :  { %610 = vmatmul.mubr.msk.f32.vlgmr.msra.gmra.mrb[0].mxu1 %vm278_vm2, %v223_v5 }
 0x128   :  { %612 = vmatprep.mubr.msk.f32.mxu1 %vm278_vm2, %v224_v6 }
 0x12b   :  { %613 = vmatmul.mubr.msk.f32.gmra.mrb[2].mxu1 %vm278_vm2, %v225_v7 }
 0x12c   :  { %615 = vmatprep.mubr.msk.f32.mxu1 %vm278_vm2, %v226_v8  ;;  %v486_v8 = vstv %s962_s6 }
 0x12f   :  { %616 = vmatmul.mubr.msk.f32.gmra.mrb[4].mxu1 %vm278_vm2, %v227_v9 }
 0x130   :  { %618 = vmatprep.mubr.msk.f32.mxu1 %vm278_vm2, %v228_v10 }
 0x133   :  { %619 = vmatmul.mubr.msk.f32.gmra.mrb[6].mxu1 %vm278_vm2, %v229_v11 }
 0x1fa   :  { %v611_v21 = vpop.f32.mrb[0].mxu1 }
 0x1fb   :  { %v375_v23 = vadd.f32 %v611_v21, %v246_v13  ;;  %v369_v24 = vpop.f32.mrb[1].mxu1 }
 0x1fc   :  { %v370_v25 = vadd.f32 %v369_v24, %v241_v12 }
 0x1fd   :  { %v409_v26 = vmax.f32 %v375_v23, 0.0 }
 0x1fe   :  { %v408_v27 = vmax.f32 %v370_v25, 0.0  ;;  %v614_v28 = vpop.f32.mrb[2].mxu1 }
 0x1ff   :  { %v465_v30 = vmul.f32 %v432_v17, %v409_v26  ;;  %v385_v31 = vadd.f32 %v614_v28, %v256_v15  ;;  %v379_v32 = vpop.f32.mrb[3].mxu1 }
 0x200   :  { %v464_v33 = vmul.f32 %v427_v16, %v408_v27  ;;  %v380_v34 = vadd.f32 %v379_v32, %v251_v14 }
 0x201   :  { %v411_v37 = vmax.f32 %v385_v31, 0.0 }
 0x202   :  { %v472_v36 = vadd.f32 %v465_v30, %v464_v33  ;;  %v410_v38 = vmax.f32 %v380_v34, 0.0  ;;  %v617_v39 = vpop.f32.mrb[4].mxu1 }
 0x203   :  { %v395_v40 = vadd.f32 %v617_v39, %v266_v20  ;;  %v389_v41 = vpop.f32.mrb[5].mxu1  ;;  %v467_v45 = vmul.f32 %v442_v22, %v411_v37 }
 0x204   :  { %v466_v42 = vmul.f32 %v437_v19, %v410_v38  ;;  %v390_v43 = vadd.f32 %v389_v41, %v261_v18 }
 0x205   :  { %v413_v47 = vmax.f32 %v395_v40, 0.0 }
 0x206   :  { %v473_v46 = vadd.f32 %v472_v36, %v466_v42  ;;  %v412_v48 = vmax.f32 %v390_v43, 0.0  ;;  %v620_v49 = vpop.f32.mrb[6].mxu1 }
 0x207   :  { %v405_v51 = vadd.f32 %v620_v49, %v276_v44  ;;  %v399_v52 = vpop.f32.mrb[7].mxu1  ;;  %v469_v56 = vmul.f32 %v452_v50, %v413_v47 }
 0x208   :  { %v468_v53 = vmul.f32 %v447_v35, %v412_v48  ;;  %v474_v54 = vadd.f32 %v473_v46, %v467_v45  ;;  %v400_v55 = vadd.f32 %v399_v52, %v271_v29 }
 0x209   :  { %v415_v58 = vmax.f32 %v405_v51, 0.0 }
 0x20a   :  { %v475_v57 = vadd.f32 %v474_v54, %v468_v53  ;;  %v414_v59 = vmax.f32 %v400_v55, 0.0 }
 0x20b   :  { %v471_v0 = vmul.f32 %v462_v63, %v415_v58 }
 0x20c   :  { %v470_v61 = vmul.f32 %v457_v60, %v414_v59  ;;  %v476_v62 = vadd.f32 %v475_v57, %v469_v56 }
 0x20e   :  { %v477_v1 = vadd.f32 %v476_v62, %v470_v61 }
 0x210   :  { %v478_v2 = vadd.f32 %v477_v1, %v471_v0 }
 0x212   :  { %v479_v3 = vrot.slane %v478_v2, 4 }
 0x214   :  { %v480_v4 = vadd.f32 %v479_v3, %v478_v2 }
 0x216   :  { %v481_v5 = vrot.slane %v480_v4, 2 }
 0x218   :  { %v482_v6 = vadd.f32 %v481_v5, %v480_v4 }
 0x21a   :  { %v483_v7 = vrot.slane %v482_v6, 1 }
 0x21c   :  { %v484_v9 = vadd.f32 %v483_v7, %v482_v6 }
 0x21e   :  { %v487_v10 = vadd.f32 %v486_v8, %v484_v9 }
 0x220   :  { %488 = vst [vmem:[#allocation3] sm:$0x1] %v487_v10 }
 0x221   :  { %692 = shalt.err (!%p689_p4)
}
 0x222   :  { %s693_s26 = scalar_lea.hbm %s963_s7, 16 }
 0x223   :  { %p694_p5 = scmp.ne.s32.totalorder %s963_s7, %s693_s26  ;;  %p697_p6 = scmp.lt.u32.totalorder %s693_s26, %s963_s7 }
 0x225   :  { %p699_p7 = pnand %p697_p6, %p694_p5 }
 0x227   :  { %702 = shalt.err (!%p699_p7)
}
 0x228   :  { %498 = dma.vmem_to_hbm [thread:$0]  %s496_s22, 16, %s963_s7, [#allocation4]  }
 0x229   :  { %703 = dma.done.wait [#allocation4], 16  }
 0x22a   :  { %704 = vsyncadd [#allocation4], 4294967280 }
 0x22b   :  { %502 = vsyncpa [#allocation4], 1 }

// kernel: tpu_custom_call.1
= control target key start
LH: loop header
LB: loop body
LE: loop exit
PB: predicated region body
PF: predicated region fallthrough
CT: control target
= control target key end

     0   :  { %vm72_vm0 = vcmask 130048   ;;  %v705_v6 = vmov 0   ;;  %s956_s0 = inlined_call_operand.vmem [shape: f32[16,16], index: 0, kind: input, shape index: {}]   ;;  %s957_s1 = inlined_call_operand.vmem [shape: f32[32,16], index: 1, kind: input, shape index: {}]   ;;  %s958_s2 = inlined_call_operand.vmem [shape: f32[32,1], index: 2, kind: input, shape index: {}]   ;;  %s959_s3 = inlined_call_operand.vmem [shape: f32[64,32], index: 3, kind: input, shape index: {}]   ;;  %s960_s4 = inlined_call_operand.vmem [shape: f32[64,1], index: 4, kind: input, shape index: {}]   ;;  %s961_s5 = inlined_call_operand.vmem [shape: f32[64,1], index: 5, kind: input, shape index: {}]   ;;  %s962_s6 = inlined_call_operand.<no memory space> [shape: f32[1], index: 6, kind: input, shape index: {}]   ;;  %s963_s7 = inlined_call_operand.hbm [shape: f32[1,128], index: 7, kind: output, shape index: {}]  }
   0x1   :  { %v32_v0 = vld [vmem:[%s956_s0] sm:$0xff]  ;;  %v33_v1 = vld [vmem:[%s956_s0 + $0x8] sm:$0xff]  ;;  %v34_v2 = vld [vmem:[%s956_s0 + $0x10] sm:$0xff]  ;;  %679 = vset.pattern.permute.xlu0 %v705_v6  ;;  %680 = vset.pattern.permute.xlu1 %v705_v6 }
   0x2   :  { %v621_v3 = vpack.c.bf16 %v33_v1, %v32_v0  ;;  %vm758_vm1 = vmpackc.low %vm72_vm0, %vm72_vm0  ;;  %v35_v5 = vld [vmem:[%s956_s0 + $0x18] sm:$0xff]  ;;  %v28_v8 = vld [vmem:[%s957_s1] sm:$0xff] }
   0x3   :  { %v627_v7 = vpack.c.bf16 %v35_v5, %v34_v2  ;;  %v36_v9 = vld [vmem:[%s956_s0 + $0x20] sm:$0xff]  ;;  %v37_v10 = vld [vmem:[%s956_s0 + $0x28] sm:$0xff]  ;;  %595 = vmatprep.mubr.msk.f32.mxu0 %vm72_vm0, %v28_v8  ;;  %v50_v12 = vld [vmem:[%s958_s2 + $0x10] sm:$0xff] }
   0x4   :  { %623 = vmatprep.subr.msk.bf16.mxu0 %vm758_vm1, %v621_v3  ;;  %v48_v11 = vld [vmem:[%s958_s2] sm:$0xff]  ;;  %64 = vperm.xlu1 %680, %v50_v12   ;;  %v633_v13 = vpack.c.bf16 %v37_v10, %v36_v9  ;;  %v49_v14 = vld [vmem:[%s958_s2 + $0x8] sm:$0xff]  ;;  %v51_v15 = vld [vmem:[%s958_s2 + $0x18] sm:$0xff] }
   0x5   :  { %626 = vmatpush3.bf16.xpose.msk.msra.mxu0 %vm758_vm1, %v621_v3  ;;  %54 = vperm.xlu0 %679, %v48_v11   ;;  %v230_v16 = vld [vmem:[%s960_s4] sm:$0xff] }
   0x6   :  { %629 = vmatprep.subr.msk.bf16.mxu0 %vm758_vm1, %v627_v7 }
   0x8   :  { %69 = vperm.xlu1 %680, %v51_v15  }
   0x9   :  { %59 = vperm.xlu0 %679, %v49_v14  }
   0xd   :  { %632 = vmatpush3.bf16.xpose.msk.msra.mxu0 %vm758_vm1, %v627_v7 }
   0xe   :  { %635 = vmatprep.subr.msk.bf16.mxu0 %vm758_vm1, %v633_v13 }
   0xf   :  { %13 = vsyncpa [#allocation4], 0  ;;  %v38_v17 = vld [vmem:[%s956_s0 + $0x30] sm:$0xff]  ;;  %v39_v18 = vld [vmem:[%s956_s0 + $0x38] sm:$0xff]  ;;  %240 = vperm.xlu0 %679, %v230_v16   ;;  %vm278_vm2 = vcmask 261120   ;;  %s706_s21 = smov [#allocation3]  }
  0x10   :  { %v231_v19 = vld [vmem:[%s960_s4 + $0x8] sm:$0xff]  ;;  %v639_v20 = vpack.c.bf16 %v39_v18, %v38_v17  ;;  %v232_v21 = vld [vmem:[%s960_s4 + $0x10] sm:$0xff]  ;;  %v233_v22 = vld [vmem:[%s960_s4 + $0x18] sm:$0xff]  ;;  %s495_s22 = sshll.u32 %s706_s21, 4  ;;  %s496_s22 = int_to_ptr.vmem [resolvable:$true] %s495_s22 }
  0x11   :  { %245 = vperm.xlu1 %680, %v231_v19   ;;  %v416_v23 = vld [vmem:[%s961_s5] sm:$0xff]  ;;  %v41_v25 = vld [vmem:[%s956_s0 + $0x48] sm:$0xff]  ;;  %v418_v29 = vld [vmem:[%s961_s5 + $0x10] sm:$0xff]  ;;  %s681_s23 = scalar_lea.vmem %s496_s22, 16  ;;  %s685_s24 = scalar_lea.vmem %s496_s22, 32 }
  0x12   :  { %v40_v24 = vld [vmem:[%s956_s0 + $0x40] sm:$0xff]  ;;  %v417_v26 = vld [vmem:[%s961_s5 + $0x8] sm:$0xff]  ;;  %v42_v31 = vld [vmem:[%s956_s0 + $0x50] sm:$0xff]  ;;  %p682_p0 = scmp.ne.s32.totalorder %s496_s22, %s681_s23  ;;  %p686_p1 = scmp.lt.s32.totalorder %s496_s22, %s496_s22 }
  0x13   :  { %250 = vperm.xlu0 %679, %v232_v21   ;;  %v645_v27 = vpack.c.bf16 %v41_v25, %v40_v24  ;;  %v234_v28 = vld [vmem:[%s960_s4 + $0x20] sm:$0xff]  ;;  %v235_v30 = vld [vmem:[%s960_s4 + $0x28] sm:$0xff]  ;;  %v43_v32 = vld [vmem:[%s956_s0 + $0x58] sm:$0xff]  ;;  %p687_p2 = scmp.lt.s32.totalorder %s685_s24, %s681_s23 }
  0x14   :  { %v419_v33 = vld [vmem:[%s961_s5 + $0x18] sm:$0xff]  ;;  %v651_v34 = vpack.c.bf16 %v43_v32, %v42_v31  ;;  %v236_v35 = vld [vmem:[%s960_s4 + $0x30] sm:$0xff]  ;;  %v420_v36 = vld [vmem:[%s961_s5 + $0x20] sm:$0xff] }
  0x15   :  { %638 = vmatpush3.bf16.xpose.msk.msra.mxu0 %vm758_vm1, %v633_v13  ;;  %255 = vperm.xlu1 %680, %v233_v22   ;;  %v237_v37 = vld [vmem:[%s960_s4 + $0x38] sm:$0xff]  ;;  %v44_v38 = vld [vmem:[%s956_s0 + $0x60] sm:$0xff]  ;;  %v45_v39 = vld [vmem:[%s956_s0 + $0x68] sm:$0xff]  ;;  %p688_p3 = por %p687_p2, %p686_p1 }
  0x16   :  { %641 = vmatprep.subr.msk.bf16.mxu0 %vm758_vm1, %v639_v20  ;;  %v421_v40 = vld [vmem:[%s961_s5 + $0x28] sm:$0xff]  ;;  %v657_v41 = vpack.c.bf16 %v45_v39, %v44_v38  ;;  %v422_v42 = vld [vmem:[%s961_s5 + $0x30] sm:$0xff]  ;;  %v423_v43 = vld [vmem:[%s961_s5 + $0x38] sm:$0xff] }
  0x17   :  { %426 = vperm.xlu0 %679, %v416_v23   ;;  %v46_v44 = vld [vmem:[%s956_s0 + $0x70] sm:$0xff]  ;;  %v47_v45 = vld [vmem:[%s956_s0 + $0x78] sm:$0xff]  ;;  %v29_v47 = vld [vmem:[%s957_s1 + $0x8] sm:$0xff]  ;;  %p689_p4 = pnand %p688_p3, %p682_p0 }
  0x18   :  { %v663_v46 = vpack.c.bf16 %v47_v45, %v46_v44  ;;  %v30_v48 = vld [vmem:[%s957_s1 + $0x10] sm:$0xff]  ;;  %v31_v49 = vld [vmem:[%s957_s1 + $0x18] sm:$0xff]  ;;  %v222_v50 = vld [vmem:[%s959_s3] sm:$0xff] }
  0x19   :  { %431 = vperm.xlu1 %680, %v417_v26   ;;  %609 = vmatprep.mubr.msk.f32.mxu1 %vm278_vm2, %v222_v50  ;;  %v223_v5 = vld [vmem:[%s959_s3 + $0x8] sm:$0xff]  ;;  %v224_v6 = vld [vmem:[%s959_s3 + $0x10] sm:$0xff]  ;;  %v225_v7 = vld [vmem:[%s959_s3 + $0x18] sm:$0xff] }
  0x1a   :  { %v226_v8 = vld [vmem:[%s959_s3 + $0x20] sm:$0xff]  ;;  %v227_v9 = vld [vmem:[%s959_s3 + $0x28] sm:$0xff]  ;;  %v228_v10 = vld [vmem:[%s959_s3 + $0x30] sm:$0xff] }
  0x1b   :  { %260 = vperm.xlu0 %679, %v234_v28   ;;  %v229_v11 = vld [vmem:[%s959_s3 + $0x38] sm:$0xff] }
  0x1d   :  { %644 = vmatpush3.bf16.xpose.msk.msra.mxu0 %vm758_vm1, %v639_v20  ;;  %436 = vperm.xlu1 %680, %v418_v29  }
  0x1e   :  { %647 = vmatprep.subr.msk.bf16.mxu0 %vm758_vm1, %v645_v27 }
  0x1f   :  { %265 = vperm.xlu0 %679, %v235_v30  }
  0x21   :  { %441 = vperm.xlu1 %680, %v419_v33  }
  0x23   :  { %270 = vperm.xlu0 %679, %v236_v35  }
  0x25   :  { %650 = vmatpush3.bf16.xpose.msk.msra.mxu0 %vm758_vm1, %v645_v27  ;;  %446 = vperm.xlu1 %680, %v420_v36  }
  0x26   :  { %653 = vmatprep.subr.msk.bf16.mxu0 %vm758_vm1, %v651_v34 }
  0x27   :  { %275 = vperm.xlu0 %679, %v237_v37  }
  0x29   :  { %451 = vperm.xlu1 %680, %v421_v40  }
  0x2b   :  { %456 = vperm.xlu0 %679, %v422_v42  }
  0x2d   :  { %656 = vmatpush3.bf16.xpose.msk.msra.mxu0 %vm758_vm1, %v651_v34  ;;  %461 = vperm.xlu1 %680, %v423_v43  }
  0x2e   :  { %659 = vmatprep.subr.msk.bf16.mxu0 %vm758_vm1, %v657_v41 }
  0x35   :  { %662 = vmatpush3.bf16.xpose.msk.msra.mxu0 %vm758_vm1, %v657_v41 }
  0x36   :  { %665 = vmatprep.subr.msk.bf16.mxu0 %vm758_vm1, %v663_v46 }
  0x3d   :  { %668 = vmatpush3.bf16.xpose.msk.msra.mxu0 %vm758_vm1, %v663_v46 }
  0x44   :  { %596 = vmatmul.mubr.msk.f32.vlgmr.msra.gmra.mrb[0].mxu0 %vm72_vm0, %v29_v47 }
  0x45   :  { %598 = vmatprep.mubr.msk.f32.mxu0 %vm72_vm0, %v30_v48 }
  0x48   :  { %599 = vmatmul.mubr.msk.f32.gmra.mrb[2].mxu0 %vm72_vm0, %v31_v49 }
  0x83   :  { %v65_v52 = vpop.permute.xlu1 %64 }
  0x84   :  { %v55_v51 = vpop.permute.xlu0 %54 }
  0x87   :  { %v70_v59 = vpop.permute.xlu1 %69 }
  0x88   :  { %v60_v53 = vpop.permute.xlu0 %59 }
  0x8e   :  { %v241_v12 = vpop.permute.xlu0 %240 }
  0x90   :  { %v246_v13 = vpop.permute.xlu1 %245 }
  0x92   :  { %v251_v14 = vpop.permute.xlu0 %250 }
  0x94   :  { %v256_v15 = vpop.permute.xlu1 %255 }
  0x96   :  { %v427_v16 = vpop.permute.xlu0 %426 }
  0x98   :  { %v432_v17 = vpop.permute.xlu1 %431 }
  0x9a   :  { %v261_v18 = vpop.permute.xlu0 %260 }
  0x9c   :  { %v437_v19 = vpop.permute.xlu1 %436 }
  0x9e   :  { %v266_v20 = vpop.permute.xlu0 %265 }
  0xa0   :  { %v442_v22 = vpop.permute.xlu1 %441 }
  0xa2   :  { %v271_v29 = vpop.permute.xlu0 %270 }
  0xa4   :  { %v447_v35 = vpop.permute.xlu1 %446 }
  0xa6   :  { %v276_v44 = vpop.permute.xlu0 %275 }
  0xa8   :  { %v452_v50 = vpop.permute.xlu1 %451 }
 0x117   :  { %v597_v54 = vpop.f32.mrb[0].mxu0 }
 0x118   :  { %v205_v55 = vadd.f32 %v597_v54, %v60_v53  ;;  %v199_v56 = vpop.f32.mrb[1].mxu0 }
 0x119   :  { %v200_v57 = vadd.f32 %v199_v56, %v55_v51 }
 0x11a   :  { %v219_v58 = vmax.f32 %v205_v55, 0.0 }
 0x11b   :  { %v218_v60 = vmax.f32 %v200_v57, 0.0  ;;  %v600_v61 = vpop.f32.mrb[2].mxu0 }
 0x11c   :  { %v215_v62 = vadd.f32 %v600_v61, %v70_v59  ;;  %v209_v63 = vpop.f32.mrb[3].mxu0 }
 0x11d   :  { %v210_v0 = vadd.f32 %v209_v63, %v65_v52  ;;  %v669_v1 = vpack.c.bf16 %v219_v58, %v218_v60  ;;  %v457_v60 = vpop.permute.xlu0 %456  ;;  %v462_v63 = vpop.permute.xlu1 %461 }
 0x11e   :  { %v221_v2 = vmax.f32 %v215_v62, 0.0 }
 0x11f   :  { %v220_v3 = vmax.f32 %v210_v0, 0.0  ;;  %670 = vmatprep.subr.bf16.mxu1 %v669_v1 }
 0x120   :  { %672 = vmatpush3.bf16.msra.mxu1 %v669_v1 }
 0x121   :  { %v673_v4 = vpack.c.bf16 %v221_v2, %v220_v3 }
 0x123   :  { %674 = vmatprep.subr.bf16.mxu1 %v673_v4 }
 0x124   :  { %676 = vmatpush3.bf16.msra.mxu1 %v673_v4 }
 0x127   :  { %610 = vmatmul.mubr.msk.f32.vlgmr.msra.gmra.mrb[0].mxu1 %vm278_vm2, %v223_v5 }
 0x128   :  { %612 = vmatprep.mubr.msk.f32.mxu1 %vm278_vm2, %v224_v6 }
 0x12b   :  { %613 = vmatmul.mubr.msk.f32.gmra.mrb[2].mxu1 %vm278_vm2, %v225_v7 }
 0x12c   :  { %615 = vmatprep.mubr.msk.f32.mxu1 %vm278_vm2, %v226_v8  ;;  %v486_v8 = vstv %s962_s6 }
 0x12f   :  { %616 = vmatmul.mubr.msk.f32.gmra.mrb[4].mxu1 %vm278_vm2, %v227_v9 }
 0x130   :  { %618 = vmatprep.mubr.msk.f32.mxu1 %vm278_vm2, %v228_v10 }
 0x133   :  { %619 = vmatmul.mubr.msk.f32.gmra.mrb[6].mxu1 %vm278_vm2, %v229_v11 }
 0x1fa   :  { %v611_v21 = vpop.f32.mrb[0].mxu1 }
 0x1fb   :  { %v375_v23 = vadd.f32 %v611_v21, %v246_v13  ;;  %v369_v24 = vpop.f32.mrb[1].mxu1 }
 0x1fc   :  { %v370_v25 = vadd.f32 %v369_v24, %v241_v12 }
 0x1fd   :  { %v409_v26 = vmax.f32 %v375_v23, 0.0 }
 0x1fe   :  { %v408_v27 = vmax.f32 %v370_v25, 0.0  ;;  %v614_v28 = vpop.f32.mrb[2].mxu1 }
 0x1ff   :  { %v465_v30 = vmul.f32 %v432_v17, %v409_v26  ;;  %v385_v31 = vadd.f32 %v614_v28, %v256_v15  ;;  %v379_v32 = vpop.f32.mrb[3].mxu1 }
 0x200   :  { %v464_v33 = vmul.f32 %v427_v16, %v408_v27  ;;  %v380_v34 = vadd.f32 %v379_v32, %v251_v14 }
 0x201   :  { %v411_v37 = vmax.f32 %v385_v31, 0.0 }
 0x202   :  { %v472_v36 = vadd.f32 %v465_v30, %v464_v33  ;;  %v410_v38 = vmax.f32 %v380_v34, 0.0  ;;  %v617_v39 = vpop.f32.mrb[4].mxu1 }
 0x203   :  { %v395_v40 = vadd.f32 %v617_v39, %v266_v20  ;;  %v389_v41 = vpop.f32.mrb[5].mxu1  ;;  %v467_v45 = vmul.f32 %v442_v22, %v411_v37 }
 0x204   :  { %v466_v42 = vmul.f32 %v437_v19, %v410_v38  ;;  %v390_v43 = vadd.f32 %v389_v41, %v261_v18 }
 0x205   :  { %v413_v47 = vmax.f32 %v395_v40, 0.0 }
 0x206   :  { %v473_v46 = vadd.f32 %v472_v36, %v466_v42  ;;  %v412_v48 = vmax.f32 %v390_v43, 0.0  ;;  %v620_v49 = vpop.f32.mrb[6].mxu1 }
 0x207   :  { %v405_v51 = vadd.f32 %v620_v49, %v276_v44  ;;  %v399_v52 = vpop.f32.mrb[7].mxu1  ;;  %v469_v56 = vmul.f32 %v452_v50, %v413_v47 }
 0x208   :  { %v468_v53 = vmul.f32 %v447_v35, %v412_v48  ;;  %v474_v54 = vadd.f32 %v473_v46, %v467_v45  ;;  %v400_v55 = vadd.f32 %v399_v52, %v271_v29 }
 0x209   :  { %v415_v58 = vmax.f32 %v405_v51, 0.0 }
 0x20a   :  { %v475_v57 = vadd.f32 %v474_v54, %v468_v53  ;;  %v414_v59 = vmax.f32 %v400_v55, 0.0 }
 0x20b   :  { %v471_v0 = vmul.f32 %v462_v63, %v415_v58 }
 0x20c   :  { %v470_v61 = vmul.f32 %v457_v60, %v414_v59  ;;  %v476_v62 = vadd.f32 %v475_v57, %v469_v56 }
 0x20e   :  { %v477_v1 = vadd.f32 %v476_v62, %v470_v61 }
 0x210   :  { %v478_v2 = vadd.f32 %v477_v1, %v471_v0 }
 0x212   :  { %v479_v3 = vrot.slane %v478_v2, 4 }
 0x214   :  { %v480_v4 = vadd.f32 %v479_v3, %v478_v2 }
 0x216   :  { %v481_v5 = vrot.slane %v480_v4, 2 }
 0x218   :  { %v482_v6 = vadd.f32 %v481_v5, %v480_v4 }
 0x21a   :  { %v483_v7 = vrot.slane %v482_v6, 1 }
 0x21c   :  { %v484_v9 = vadd.f32 %v483_v7, %v482_v6 }
 0x21e   :  { %v487_v10 = vadd.f32 %v486_v8, %v484_v9 }
 0x220   :  { %488 = vst [vmem:[#allocation3] sm:$0x1] %v487_v10 }
 0x221   :  { %692 = shalt.err (!%p689_p4)
}
 0x222   :  { %s693_s26 = scalar_lea.hbm %s963_s7, 16 }
 0x223   :  { %p694_p5 = scmp.ne.s32.totalorder %s963_s7, %s693_s26  ;;  %p697_p6 = scmp.lt.u32.totalorder %s693_s26, %s963_s7 }
 0x225   :  { %p699_p7 = pnand %p697_p6, %p694_p5 }
 0x227   :  { %702 = shalt.err (!%p699_p7)
}
 0x228   :  { %498 = dma.vmem_to_hbm [thread:$0]  %s496_s22, 16, %s963_s7, [#allocation4]  }
 0x229   :  { %703 = dma.done.wait [#allocation4], 16  }
 0x22a   :  { %704 = vsyncadd [#allocation4], 4294967280 }
 0x22b   :  { %502 = vsyncpa [#allocation4], 1 }

</bundles_post_ra>
